<compile_context>
chip_gen: v5e
topology: v5e:2x2
jax: 0.10.0
libtpu: 0.0.40
codegen_flags: <defaults>
</compile_context>

<pallas_src>
import jax
import jax.numpy as jnp
from jax.experimental import pallas as pl
from jax.experimental.pallas import tpu as pltpu

_LANE = 128


def linear_kernel(x_ref, w_ref, b_ref, o_ref, acc_ref):
    """One (tm, tn) output tile; grid axis 2 (last, 'arbitrary') iterates K."""
    k = pl.program_id(2)

    @pl.when(k == 0)
    def _init():
        acc_ref[...] = jnp.zeros_like(acc_ref)

    # x tile: (tm, tk) bf16 ; w tile: (tk, tn) bf16 (pre-transposed at init).
    # Standard A@B contraction -> MXU-native stationary layout, f32 accumulate.
    acc_ref[...] += jnp.dot(
        x_ref[...], w_ref[...], preferred_element_type=jnp.float32
    )

    @pl.when(k == pl.num_programs(2) - 1)
    def _finalize():
        # Bias added exactly once, on the final K step.
        o_ref[...] = (acc_ref[...] + b_ref[...]).astype(o_ref.dtype)


def _round_up(x, m):
    return ((x + m - 1) // m) * m


def prepare_params(weight, bias, *, lane=_LANE, param_dtype=jnp.bfloat16):
    """One-time (init-time) layout prep.

    weight: (out_size, in_size) PyTorch layout.
    Returns:
      w_t:  (K_pad, N_pad) param_dtype — transposed, zero-padded on both dims.
      b_p:  (1, N_pad) float32 — zero-padded bias row.
    Padding is numerically exact (zeros contribute nothing); the wrapper
    slices the output back to the true out_size.
    """
    out_size, in_size = weight.shape
    n_pad = _round_up(out_size, lane)
    k_pad = _round_up(in_size, lane)

    w_t = jnp.pad(weight.T, ((0, k_pad - in_size), (0, n_pad - out_size)))
    w_t = w_t.astype(param_dtype)
    b_p = jnp.pad(bias, (0, n_pad - out_size)).astype(jnp.float32)
    b_p = b_p.reshape(1, n_pad)
    return w_t, b_p


def _vmem_cap_bytes():
    """~75% of per-core VMEM (96 MiB on v5e/v6e, 48 MiB on v7x); safe fallback."""
    try:
        info = pltpu.get_tpu_info()
        cap = getattr(info, "vmem_capacity_bytes", None)
        if cap:
            return int(cap) * 3 // 4
    except Exception:
        pass
    return 64 * 2**20


def l2_regression_forward(x, weight_t, bias_p, out_size, *,
                          tm=None, tn=None, tk=None,
                          compute_dtype=jnp.bfloat16):
    """Forward of L2Regression: x @ weight.T + bias.

    x:        (B, in_size) float32
    weight_t: (K_pad, N_pad) — output of prepare_params (pre-transposed, padded)
    bias_p:   (1, N_pad) float32
    out_size: true output size (<= N_pad); result is (B, out_size) float32.
    """
    B, in_size = x.shape
    k_pad, n_pad = weight_t.shape

    # Boundary cast / K padding of the activation (exact: padded weight rows
    # are zero, so padded x columns never contribute).
    if in_size != k_pad:
        x = jnp.pad(x, ((0, 0), (0, k_pad - in_size)))
    x = x.astype(compute_dtype)

    # ---- tile selection (generation-aware-ish, VMEM-generous) ----
    if tm is None:
        tm = B if B <= 512 else 512                       # ragged last M tile OK
    if tn is None:
        if n_pad <= 512:
            tn = n_pad
        elif n_pad % 512 == 0:
            tn = 512
        elif n_pad % 256 == 0:
            tn = 256
        else:
            tn = 128
    if tk is None:
        tk = 128
        for cand in (2048, 1024, 512, 256):
            if k_pad % cand == 0:
                tk = cand
                break

    # v7x megacore: if the M axis has a single program, make sure the N
    # ("parallel") axis has >= 2 programs so both TensorCores are used.
    if pl.cdiv(B, tm) == 1 and n_pad >= 256 and n_pad // tn < 2:
        tn = n_pad // 2 if (n_pad // 2) % _LANE == 0 else _LANE

    grid = (pl.cdiv(B, tm), n_pad // tn, k_pad // tk)

    # VMEM budget: double-buffered bf16 inputs, f32 bias/output, f32 accumulator.
    in_bytes = jnp.dtype(compute_dtype).itemsize
    tile_bytes = (2 * tm * tk * in_bytes      # x tiles (x2 buffers)
                  + 2 * tk * tn * in_bytes    # weight tiles
                  + 2 * tn * 4                # bias
                  + 2 * tm * tn * 4           # output tiles
                  + tm * tn * 4)              # accumulator scratch
    vmem_limit = int(min(_vmem_cap_bytes(), max(32 * 2**20, 4 * tile_bytes)))

    cost = pl.CostEstimate(
        flops=2 * B * n_pad * k_pad,
        transcendentals=0,
        bytes_accessed=(B * k_pad * in_bytes + k_pad * n_pad * in_bytes
                        + n_pad * 4 + B * n_pad * 4),
    )

    out_p = pl.pallas_call(
        linear_kernel,
        out_shape=jax.ShapeDtypeStruct((B, n_pad), jnp.float32),
        grid_spec=pltpu.PrefetchScalarGridSpec(
            num_scalar_prefetch=0,
            grid=grid,
            in_specs=[
                pl.BlockSpec((tm, tk), lambda i, j, k: (i, k)),   # x
                pl.BlockSpec((tk, tn), lambda i, j, k: (k, j)),   # weight (K, N)
                pl.BlockSpec((1, tn), lambda i, j, k: (0, j)),    # bias row
            ],
            out_specs=pl.BlockSpec((tm, tn), lambda i, j, k: (i, j)),
            scratch_shapes=[pltpu.VMEM((tm, tn), jnp.float32)],
        ),
        compiler_params=pltpu.CompilerParams(
            dimension_semantics=("parallel", "parallel", "arbitrary"),
            vmem_limit_bytes=vmem_limit,
        ),
        cost_estimate=cost,
    )(x, weight_t, bias_p)

    if out_size == n_pad:
        return out_p
    # TODO(synk): consumers that tolerate the lane-padded (B, N_pad) output can
    # skip this slice (it is an extra HBM read+write of the output).
    return out_p[:, :out_size]


if __name__ == "__main__":
    # L2Regression(input_size, output_size) -> nn.Linear forward.
    batch, input_size, output_size = 8, 32, 16

    key = jax.random.PRNGKey(0)
    kx, kw, kb = jax.random.split(key, 3)

    x = jax.random.normal(kx, (batch, input_size), dtype=jnp.float32)
    # Deterministic init mimicking nn.Linear's uniform(-1/sqrt(in), 1/sqrt(in))
    bound = 1.0 / (input_size ** 0.5)
    weight = jax.random.uniform(kw, (output_size, input_size),
                                minval=-bound, maxval=bound, dtype=jnp.float32)
    bias = jax.random.uniform(kb, (output_size,),
                              minval=-bound, maxval=bound, dtype=jnp.float32)

    # Init-time parameter layout prep (transpose + pad + bf16 cast; done once).
    weight_t, bias_p = prepare_params(weight, bias)

    out = l2_regression_forward(x, weight_t, bias_p, output_size)
    out = jax.block_until_ready(out)

    # Reference 1: bf16-cast inputs, f32 accumulate — matches kernel numerics.
    x_bf = x.astype(jnp.bfloat16).astype(jnp.float32)
    w_bf = weight.astype(jnp.bfloat16).astype(jnp.float32)
    ref_bf = x_bf @ w_bf.T + bias
    # Reference 2: full f32 reference — loose tolerance for the bf16 cast.
    ref_f32 = x @ weight.T + bias

    assert out.shape == (batch, output_size)
    assert jnp.allclose(out, ref_bf, atol=1e-4, rtol=1e-4), "mismatch vs bf16 ref"
    assert jnp.allclose(out, ref_f32, atol=3e-2, rtol=3e-2), "mismatch vs f32 ref"

    print("KERNEL_OK")
</pallas_src>

<mosaic_0001>
module attributes {stable_mosaic.version = 11 : i64} {
  func.func @linear_kernel(%arg0: i32, %arg1: i32, %arg2: i32, %arg3: memref<8x128xbf16, #tpu.memory_space<vmem>>, %arg4: memref<128x128xbf16, #tpu.memory_space<vmem>>, %arg5: memref<1x128xf32, #tpu.memory_space<vmem>>, %arg6: memref<8x128xf32, #tpu.memory_space<vmem>>, %arg7: memref<8x128xf32, #tpu.memory_space<vmem>>) attributes {dimension_semantics = [#tpu.dimension_semantics<parallel>, #tpu.dimension_semantics<parallel>, #tpu.dimension_semantics<arbitrary>], iteration_bounds = array<i64: 1, 1, 1>, scalar_prefetch = 0 : i64, scratch_operands = 1 : i64, tpu.core_type = #tpu.core_type<tc>, window_params = [{transform_indices = @transform_0, window_bounds = array<i64: 8, 128>}, {transform_indices = @transform_1, window_bounds = array<i64: 128, 128>}, {transform_indices = @transform_2, window_bounds = array<i64: 1, 128>}, {transform_indices = @transform_3, window_bounds = array<i64: 8, 128>}]} {
    %c0_i32 = arith.constant 0 : i32
    %0 = arith.cmpi eq, %arg2, %c0_i32 : i32
    %1 = arith.extui %0 : i1 to i32
    %c0_i32_0 = arith.constant 0 : i32
    %2 = arith.cmpi ne, %1, %c0_i32_0 : i32
    scf.if %2 {
      %cst_10 = arith.constant 0.000000e+00 : f32
      %12 = vector.broadcast %cst_10 : f32 to vector<8x128xf32>
      %c0_11 = arith.constant 0 : index
      %c0_12 = arith.constant 0 : index
      %13 = vector.load %arg7[%c0_11, %c0_12] : memref<8x128xf32, #tpu.memory_space<vmem>>, vector<8x128xf32>
      tpu.vector_store %arg7[%c0_11, %c0_12], %12 {strides = array<i32>} : memref<8x128xf32, #tpu.memory_space<vmem>>, vector<8x128xf32>,
    } else {
    }
    %c0 = arith.constant 0 : index
    %c0_1 = arith.constant 0 : index
    %3 = vector.load %arg7[%c0, %c0_1] : memref<8x128xf32, #tpu.memory_space<vmem>>, vector<8x128xf32>
    %c0_2 = arith.constant 0 : index
    %c0_3 = arith.constant 0 : index
    %4 = vector.load %arg3[%c0_2, %c0_3] : memref<8x128xbf16, #tpu.memory_space<vmem>>, vector<8x128xbf16>
    %c0_4 = arith.constant 0 : index
    %c0_5 = arith.constant 0 : index
    %5 = vector.load %arg4[%c0_4, %c0_5] : memref<128x128xbf16, #tpu.memory_space<vmem>>, vector<128x128xbf16>
    %cst = arith.constant dense<0.000000e+00> : vector<8x128xf32>
    %6 = tpu.matmul %4, %5, %cst {dimension_numbers = #tpu.dot_dimension_numbers<[1], [0], [0], [1], [0, 0, 1, 1], [], []>} : vector<8x128xbf16>, vector<128x128xbf16>, vector<8x128xf32> -> vector<8x128xf32>
    %7 = arith.addf %3, %6 : vector<8x128xf32>
    %c0_6 = arith.constant 0 : index
    %c0_7 = arith.constant 0 : index
    %8 = vector.load %arg7[%c0_6, %c0_7] : memref<8x128xf32, #tpu.memory_space<vmem>>, vector<8x128xf32>
    tpu.vector_store %arg7[%c0_6, %c0_7], %7 {strides = array<i32>} : memref<8x128xf32, #tpu.memory_space<vmem>>, vector<8x128xf32>,
    %c0_i32_8 = arith.constant 0 : i32
    %9 = arith.cmpi eq, %arg2, %c0_i32_8 : i32
    %10 = arith.extui %9 : i1 to i32
    %c0_i32_9 = arith.constant 0 : i32
    %11 = arith.cmpi ne, %10, %c0_i32_9 : i32
    scf.if %11 {
      %c0_10 = arith.constant 0 : index
      %c0_11 = arith.constant 0 : index
      %12 = vector.load %arg7[%c0_10, %c0_11] : memref<8x128xf32, #tpu.memory_space<vmem>>, vector<8x128xf32>
      %c0_12 = arith.constant 0 : index
      %c0_13 = arith.constant 0 : index
      %13 = vector.load %arg5[%c0_12, %c0_13] : memref<1x128xf32, #tpu.memory_space<vmem>>, vector<1x128xf32>
      %14 = vector.broadcast %13 : vector<1x128xf32> to vector<8x128xf32>
      %15 = arith.addf %12, %14 : vector<8x128xf32>
      %c0_14 = arith.constant 0 : index
      %c0_15 = arith.constant 0 : index
      %16 = vector.load %arg6[%c0_14, %c0_15] : memref<8x128xf32, #tpu.memory_space<vmem>>, vector<8x128xf32>
      tpu.vector_store %arg6[%c0_14, %c0_15], %15 {strides = array<i32>} : memref<8x128xf32, #tpu.memory_space<vmem>>, vector<8x128xf32>,
    } else {
    }
    return
  }
  func.func @transform_0(%arg0: i32, %arg1: i32, %arg2: i32) -> (i32, i32) {
    %c0_i32 = arith.constant 0 : i32
    return %arg0, %arg2 : i32, i32
  }
  func.func @transform_1(%arg0: i32, %arg1: i32, %arg2: i32) -> (i32, i32) {
    %c0_i32 = arith.constant 0 : i32
    return %arg2, %arg1 : i32, i32
  }
  func.func @transform_2(%arg0: i32, %arg1: i32, %arg2: i32) -> (i32, i32) {
    %c0_i32 = arith.constant 0 : i32
    %c0_i32_0 = arith.constant 0 : i32
    return %c0_i32, %arg1 : i32, i32
  }
  func.func @transform_3(%arg0: i32, %arg1: i32, %arg2: i32) -> (i32, i32) {
    %c0_i32 = arith.constant 0 : i32
    return %arg0, %arg1 : i32, i32
  }
}

</mosaic_0001>

<bundles_post_ra>
// kernel: tpu_custom_call.1
= control target key start
LH: loop header
LB: loop body
LE: loop exit
PB: predicated region body
PF: predicated region fallthrough
CT: control target
= control target key end

     0   :  { %8 = vsyncpa [#allocation4], 0  ;;  %s320_s0 = inlined_call_operand.hbm [shape: bf16[8,128], index: 0, kind: input, shape index: {}]   ;;  %s321_s1 = inlined_call_operand.hbm [shape: bf16[128,128], index: 1, kind: input, shape index: {}]   ;;  %s322_s2 = inlined_call_operand.vmem [shape: f32[1,128], index: 2, kind: input, shape index: {}]   ;;  %s323_s3 = inlined_call_operand.hbm [shape: f32[8,128], index: 3, kind: output, shape index: {}]  }
   0x1   :  { %9 = vsyncpa [#allocation7], 0 }
   0x2   :  { %10 = vsyncpa [#allocation5], 0  ;;  %s16_s14 = sshll.u32 %s320_s0, 4  ;;  %s283_s15 = smov [#allocation3]   ;;  %s17_s14 = int_to_ptr.hbm [resolvable:$true] %s16_s14 }
   0x3   :  { %s18_s16 = sshll.u32 %s283_s15, 4  ;;  %s26_s19 = sshll.u32 %s321_s1, 4  ;;  %s19_s16 = int_to_ptr.vmem [resolvable:$true] %s18_s16  ;;  %s27_s19 = int_to_ptr.hbm [resolvable:$true] %s26_s19 }
   0x4   :  { %21 = dma.hbm_to_vmem [thread:$0]  %s17_s14, 64, %s19_s16, [#allocation4]  }
   0x5   :  { %s284_s20 = smov [#allocation6]   ;;  %s285_s22 = smov 64  }
   0x6   :  { %s28_s21 = sshll.u32 %s284_s20, 4  ;;  %s286_s23 = smov 4   ;;  %s29_s21 = int_to_ptr.vmem [resolvable:$true] %s28_s21 }
   0x7   :  { %34 = dma.hbm_to_vmem [thread:$0]  %s27_s19, 1024, %s29_s21, [#allocation7], %s285_s22, %s285_s22, %s286_s23  }
   0x8   :  { %277 = dma.done.wait [#allocation4], 64  }
   0x9   :  { %278 = vsyncadd [#allocation4], 4294967232 }
   0xa   :  { %279 = dma.done.wait [#allocation7], 1024  }
   0xb   :  { %280 = vsyncadd [#allocation7], 4294966272  ;;  %v198_v0 = vld [vmem:[#allocation6 + $0x38] sm:$0xff]  ;;  %v197_v1 = vld [vmem:[#allocation6 + $0x30] sm:$0xff]  ;;  %s287_s24 = smov [#allocation8]   ;;  %s148_s28 = sshll.u32 %s323_s3, 4  ;;  %s149_s28 = int_to_ptr.hbm [resolvable:$true] %s148_s28 }
   0xc   :  { %116 = vmatpush.bf16.msra.mxu0 %v198_v0  ;;  %v196_v2 = vld [vmem:[#allocation6 + $0x28] sm:$0xff]  ;;  %v195_v3 = vld [vmem:[#allocation6 + $0x20] sm:$0xff]  ;;  %v194_v4 = vld [vmem:[#allocation6 + $0x18] sm:$0xff]  ;;  %s146_s25 = sshll.u32 %s287_s24, 4  ;;  %s147_s25 = int_to_ptr.vmem [resolvable:$true] %s146_s25 }
   0xd   :  { %v193_v5 = vld [vmem:[#allocation6 + $0x10] sm:$0xff]  ;;  %v192_v6 = vld [vmem:[#allocation6 + $0x8] sm:$0xff]  ;;  %v191_v7 = vld [vmem:[#allocation6] sm:$0xff] }
   0xe   :  { %v51_v8 = vld [vmem:[#allocation3] sm:$0xf] }
   0xf   :  { %v204_v9 = vld [vmem:[%s322_s2] ss:$0 sm:$0xff] }
  0x10   :  { %117 = vmatpush.bf16.msra.mxu0 %v197_v1 }
  0x14   :  { %118 = vmatpush.bf16.msra.mxu0 %v196_v2 }
  0x18   :  { %119 = vmatpush.bf16.msra.mxu0 %v195_v3 }
  0x1c   :  { %120 = vmatpush.bf16.msra.mxu0 %v194_v4 }
  0x20   :  { %121 = vmatpush.bf16.msra.mxu0 %v193_v5 }
  0x24   :  { %122 = vmatpush.bf16.msra.mxu0 %v192_v6 }
  0x28   :  { %123 = vmatpush.bf16.msra.mxu0 %v191_v7 }
  0x2b   :  { %124 = vmatmul.bf16.vlgmr.msra.gmra.mxu0 %v51_v8 }
  0xa8   :  { %v125_v10 = vpop.f32.mrf.mxu0 }
  0xa9   :  { %v139_v11 = vadd.f32 %v204_v9, %v125_v10 }
  0xab   :  { %140 = vst [vmem:[#allocation8] sm:$0xff] %v139_v11 }
  0xac   :  { %151 = dma.vmem_to_hbm [thread:$0]  %s147_s25, 128, %s149_s28, [#allocation5]  }
  0xb0   :  { %v127_v12 = vpop.f32.mrf.mxu0 }
  0xb1   :  { %281 = dma.done.wait [#allocation5], 128  }
  0xb2   :  { %282 = vsyncadd [#allocation5], 4294967168 }
  0xb3   :  { %156 = vsyncpa [#allocation4], 1 }
  0xb4   :  { %157 = vsyncpa [#allocation7], 1 }
  0xb5   :  { %158 = vsyncpa [#allocation5], 1 }

</bundles_post_ra>
